<compile_context>
chip_gen: v7x
topology: tpu7x:2x2x1
jax: 0.10.0
libtpu: 0.0.40
codegen_flags: <defaults>
</compile_context>

<pallas_src>
import functools

import numpy as np
import jax
import jax.numpy as jnp
from jax import lax
from jax.experimental import pallas as pl
from jax.experimental.pallas import tpu as pltpu

NEG_SLOPE = 0.01  # PyTorch nn.LeakyReLU default


def _round_up(x: int, m: int) -> int:
    return (x + m - 1) // m * m


def _fused_cnn_kernel(x_ref, w_ref, b_ref, m_ref, o_ref, s0, s1, *,
                      layer_widx, wbuf, padl, width, final_act):
    """Fused forward of all ConvTranspose2d(k=2,s=1,p=0)+LeakyReLU layers.

    x_ref: (1, Cmax, width)        width = NB*Lpad (NB images folded on lanes)
    w_ref: (3, 4, Cmax, Cmax)      per-tap weight blocks  [in, hid, out]
    b_ref: (3, Cmax, 1)            packed biases          [in, hid, out]
    m_ref: (nlayers-1, 1, width)   per-layer valid-output masks (0/1)
    o_ref: (1, Cmax, width)        flattened final activation (unmasked)
    s0,s1: (Cmax, padl + width)    VMEM ping-pong activation buffers
    """
    cmax = o_ref.shape[1]

    # Lead zeros supply the shifted reads of the first folded image.  Done
    # unconditionally: under "parallel" semantics each core has its own scratch
    # and may never execute grid step 0, so a program_id==0 guard is unsafe.
    lead = jnp.zeros((cmax, padl), jnp.float32)
    s0[:, 0:padl] = lead
    s1[:, 0:padl] = lead
    s0[:, padl:padl + width] = x_ref[0, :, :]

    scratches = (s0, s1)
    cur = 0
    nlayers = len(layer_widx)
    shifts = (0, 1, wbuf, wbuf + 1)  # taps (0,0),(0,1),(1,0),(1,1)

    # nconvs is small and layers differ -> unroll in Python.
    for l, widx in enumerate(layer_widx):
        src = scratches[cur]
        last = (l == nlayers - 1)

        # Transposed conv: out[:, j] = sum_t W_t @ in[:, j - shifts[t]].
        # Four accumulated dots reading shifted windows directly off the ref
        # (no materialized (4*Cmax, width) im2col buffer).
        acc = jnp.dot(w_ref[widx, 0, :, :], src[:, padl:padl + width],
                      preferred_element_type=jnp.float32)
        for t in (1, 2, 3):
            s = shifts[t]
            acc = acc + jnp.dot(w_ref[widx, t, :, :],
                                src[:, padl - s:padl - s + width],
                                preferred_element_type=jnp.float32)
        y = acc + b_ref[widx, :, :]

        if (not last) or final_act:
            y = jnp.where(y >= 0.0, y, NEG_SLOPE * y)  # LeakyReLU (f32 VPU)

        if last:
            # No mask: wrapper slices out the valid region; the rest is finite
            # garbage that is never read.
            o_ref[0, :, :] = y
        else:
            # Restore exact zeros outside the valid region: the next layer's
            # implicit padding AND the inter-image zero tails rely on it.
            # (Mask broadcasts over channels; zero-padded weight/bias rows are
            # what keep the unused channel rows exactly zero.)
            scratches[1 - cur][:, padl:padl + width] = y * m_ref[l, :, :]
            cur = 1 - cur


def cnn_forward(x_nchw, params, nconvs, final_act=False, images_per_step=None):
    """Forward pass matching CNN(nconvs, in_ch, out_ch, hid_ch) (NCHW in/out).

    Layer sequence (as built by `cnn_list`):
      ConvT(in->hid)+LeakyReLU, (nconvs-2) x [ConvT(hid->hid)+LeakyReLU]
      (hidden layers SHARE weights), ConvT(hid->out) (+LeakyReLU iff final_act).
    Weights use layout (kH, kW, Cin, Cout) == torch_weight.permute(2,3,0,1).
    """
    assert nconvs >= 2, "cnn_list semantics require at least conv_in + conv_out"
    w_in, b_in, w_hid, b_hid, w_out, b_out = params

    N, in_ch, H, W = x_nchw.shape
    hid_ch = w_in.shape[3]
    out_ch = w_out.shape[3]

    nlayers = nconvs
    Hf, Wf = H + nlayers, W + nlayers            # final output spatial size
    hbuf, wbuf = Hf + 1, Wf + 1                  # padded buffer spatial size
    L = hbuf * wbuf

    # Lane-dense flat image length.  The zero tail [L:lpad] must be at least
    # wbuf+1 wide so an image's shifted reads never see the previous image's
    # valid data (batch-fold invariant).
    lpad = _round_up(L, 128)
    if lpad - L < wbuf + 1:
        lpad = _round_up(L + wbuf + 1, 128)
    assert lpad - L >= wbuf + 1, "batch-fold invariant violated"

    padl = _round_up(wbuf + 1, 128)              # leading zero region
    cmax = _round_up(max(in_ch, hid_ch, out_ch), 8)

    # ---- images per grid step (batch fold) ----
    if images_per_step is None:
        # ~24 MiB VMEM budget: 2 scratch buffers + ~4 in/out blocks in flight.
        per_image_bytes = 6 * 4 * cmax * lpad
        nb_cap = max(1, (24 << 20) // per_image_bytes)
        # Keep >= 2 grid steps when N >= 2 so v7x's two TensorCores both get
        # work; on single-TC v5e/v6e two steps of overhead are negligible.
        nb = max(1, min(nb_cap, (N + 1) // 2))
    else:
        nb = max(1, min(int(images_per_step), N))
    num_chunks = pl.cdiv(N, nb)
    n_pad = num_chunks * nb
    width = nb * lpad

    # ---- host/XLA-side (tiny, one-time) packing ----
    def pack_w(w):
        cin, cout = w.shape[2], w.shape[3]
        wp = jnp.pad(w.astype(jnp.float32),
                     ((0, 0), (0, 0), (0, cmax - cin), (0, cmax - cout)))
        # (2,2,Cmax,Cmax) -> (4,Cmax,Cmax) with W[t, co, ci] = wp[ki,kj,ci,co],
        # t = ki*2 + kj  (matches shifts (0, 1, wbuf, wbuf+1)).
        return jnp.transpose(wp.reshape(4, cmax, cmax), (0, 2, 1))

    def pack_b(b):
        b = b.astype(jnp.float32).reshape(-1)
        return jnp.pad(b, (0, cmax - b.shape[0])).reshape(cmax, 1)

    w_all = jnp.stack([pack_w(w_in), pack_w(w_hid), pack_w(w_out)])  # (3,4,C,C)
    b_all = jnp.stack([pack_b(b_in), pack_b(b_hid), pack_b(b_out)])  # (3,C,1)

    # Flat, channel-padded, spatially zero-padded, batch-folded input:
    # (num_chunks, Cmax, nb*Lpad)
    x = jnp.pad(x_nchw.astype(jnp.float32),
                ((0, n_pad - N), (0, cmax - in_ch),
                 (1, hbuf - H - 1), (1, wbuf - W - 1)))
    x = x.reshape(n_pad, cmax, L)
    x = jnp.pad(x, ((0, 0), (0, 0), (0, lpad - L)))
    x = x.reshape(num_chunks, nb, cmax, lpad)
    x = jnp.transpose(x, (0, 2, 1, 3)).reshape(num_chunks, cmax, width)

    # Static per-layer valid-output masks (last layer needs none), tiled over
    # the folded images: (nlayers-1, 1, width).
    masks_np = np.zeros((nlayers - 1, 1, lpad), np.float32)
    for l in range(nlayers - 1):
        m2 = np.zeros((hbuf, wbuf), np.float32)
        m2[1:H + l + 2, 1:W + l + 2] = 1.0
        masks_np[l, 0, :L] = m2.reshape(-1)
    masks = jnp.asarray(np.tile(masks_np, (1, 1, nb)))

    # Which packed weight each layer uses: in, hid...hid, out (shared hiddens).
    layer_widx = tuple([0] + [1] * (nconvs - 2) + [2])

    flops = int(2 * num_chunks * nlayers * 4 * cmax * cmax * width)
    bytes_accessed = int(4 * (x.size + num_chunks * cmax * width
                              + w_all.size + b_all.size + masks.size))

    kernel = functools.partial(
        _fused_cnn_kernel, layer_widx=layer_widx, wbuf=wbuf, padl=padl,
        width=width, final_act=final_act)

    out_flat = pl.pallas_call(
        kernel,
        out_shape=jax.ShapeDtypeStruct((num_chunks, cmax, width), jnp.float32),
        grid=(num_chunks,),
        in_specs=[
            pl.BlockSpec((1, cmax, width), lambda n: (n, 0, 0)),
            pl.BlockSpec((3, 4, cmax, cmax), lambda n: (0, 0, 0, 0)),
            pl.BlockSpec((3, cmax, 1), lambda n: (0, 0, 0)),
            pl.BlockSpec((nlayers - 1, 1, width), lambda n: (0, 0, 0)),
        ],
        out_specs=pl.BlockSpec((1, cmax, width), lambda n: (n, 0, 0)),
        scratch_shapes=[
            pltpu.VMEM((cmax, padl + width), jnp.float32),
            pltpu.VMEM((cmax, padl + width), jnp.float32),
        ],
        compiler_params=pltpu.CompilerParams(
            dimension_semantics=("parallel",)),
        cost_estimate=pl.CostEstimate(
            flops=flops, transcendentals=0, bytes_accessed=bytes_accessed),
    )(x, w_all, b_all, masks)

    # Cheap wrapper-side un-fold + extraction of the valid region: NCHW out.
    out = out_flat.reshape(num_chunks, cmax, nb, lpad)
    out = jnp.transpose(out, (0, 2, 1, 3)).reshape(n_pad, cmax, lpad)
    out = out[:N, :, :L].reshape(N, cmax, hbuf, wbuf)
    return out[:, :out_ch, 1:1 + Hf, 1:1 + Wf]


# ---------------- pure-JAX reference (for correctness check) ----------------
def _ref_deconv2x2(x_nchw, w, b, apply_act):
    # transposed conv == cross-correlation of 1-padded input with flipped kernel
    w_flip = w[::-1, ::-1]  # (2,2,Cin,Cout) -> HWIO
    y = lax.conv_general_dilated(
        x_nchw, w_flip, window_strides=(1, 1), padding=((1, 1), (1, 1)),
        dimension_numbers=("NCHW", "HWIO", "NCHW"))
    y = y + b.reshape(1, -1, 1, 1)
    if apply_act:
        y = jnp.where(y >= 0, y, NEG_SLOPE * y)
    return y


def _ref_forward(x_nchw, params, nconvs, final_act=False):
    w_in, b_in, w_hid, b_hid, w_out, b_out = params
    y = _ref_deconv2x2(x_nchw.astype(jnp.float32), w_in, b_in, True)
    for _ in range(nconvs - 2):
        y = _ref_deconv2x2(y, w_hid, b_hid, True)
    return _ref_deconv2x2(y, w_out, b_out, final_act)


# TODO(synk): dropout / batch_norm / custom act_fn options of cnn_list are off
# in the default CNN config and are not implemented here.

if __name__ == "__main__":
    # Config consistent with CNN(nconvs=3, in_ch=4, out_ch=2, hid_ch=8)
    nconvs, in_ch, hid_ch, out_ch = 3, 4, 8, 2
    H, W = 16, 16

    key = jax.random.PRNGKey(0)
    keys = jax.random.split(key, 8)

    def init_w(k, cin, cout):
        bound = 1.0 / np.sqrt(cin * 4.0)
        return jax.random.uniform(k, (2, 2, cin, cout), jnp.float32, -bound, bound)

    def init_b(k, cin, cout):
        bound = 1.0 / np.sqrt(cin * 4.0)
        return jax.random.uniform(k, (cout,), jnp.float32, -bound, bound)

    params = (init_w(keys[0], in_ch, hid_ch), init_b(keys[1], in_ch, hid_ch),
              init_w(keys[2], hid_ch, hid_ch), init_b(keys[3], hid_ch, hid_ch),
              init_w(keys[4], hid_ch, out_ch), init_b(keys[5], hid_ch, out_ch))

    fwd = jax.jit(cnn_forward, static_argnums=(2, 3, 4))

    # Primary case (batch=2), auto chunking.
    x = jax.random.normal(keys[6], (2, in_ch, H, W), jnp.float32)
    y = jax.block_until_ready(fwd(x, params, nconvs, False, None))
    assert y.shape == (2, out_ch, H + nconvs, W + nconvs), y.shape
    np.testing.assert_allclose(
        np.asarray(y), np.asarray(_ref_forward(x, params, nconvs, False)),
        rtol=1e-4, atol=1e-4)

    # Batch-fold path: 3 images folded per grid step + ragged batch padding.
    x5 = jax.random.normal(keys[7], (5, in_ch, H, W), jnp.float32)
    y5 = jax.block_until_ready(fwd(x5, params, nconvs, False, 3))
    np.testing.assert_allclose(
        np.asarray(y5), np.asarray(_ref_forward(x5, params, nconvs, False)),
        rtol=1e-4, atol=1e-4)

    print("KERNEL_OK")
</pallas_src>

<mosaic_0001>
module attributes {stable_mosaic.version = 11 : i64} {
  func.func @_fused_cnn_kernel(%arg0: i32, %arg1: memref<1x8x512xf32, #tpu.memory_space<vmem>>, %arg2: memref<3x4x8x8xf32, #tpu.memory_space<vmem>>, %arg3: memref<3x8x1xf32, #tpu.memory_space<vmem>>, %arg4: memref<2x1x512xf32, #tpu.memory_space<vmem>>, %arg5: memref<1x8x512xf32, #tpu.memory_space<vmem>>, %arg6: memref<8x640xf32, #tpu.memory_space<vmem>>, %arg7: memref<8x640xf32, #tpu.memory_space<vmem>>) attributes {dimension_semantics = [#tpu.dimension_semantics<parallel>], iteration_bounds = array<i64: 2>, scalar_prefetch = 0 : i64, scratch_operands = 2 : i64, tpu.core_type = #tpu.core_type<tc>, window_params = [{transform_indices = @transform_0, window_bounds = array<i64: 1, 8, 512>}, {pipeline_mode = #tpu.pipeline_mode<synchronous>, transform_indices = @transform_1, window_bounds = array<i64: 3, 4, 8, 8>}, {pipeline_mode = #tpu.pipeline_mode<synchronous>, transform_indices = @transform_2, window_bounds = array<i64: 3, 8, 1>}, {pipeline_mode = #tpu.pipeline_mode<synchronous>, transform_indices = @transform_3, window_bounds = array<i64: 2, 1, 512>}, {transform_indices = @transform_4, window_bounds = array<i64: 1, 8, 512>}]} {
    %cst = arith.constant 0.000000e+00 : f32
    %0 = vector.broadcast %cst : f32 to vector<8x128xf32>
    %c0 = arith.constant 0 : index
    %c0_0 = arith.constant 0 : index
    %1 = vector.load %arg6[%c0, %c0_0] : memref<8x640xf32, #tpu.memory_space<vmem>>, vector<8x128xf32>
    tpu.vector_store %arg6[%c0, %c0_0], %0 {strides = array<i32>} : memref<8x640xf32, #tpu.memory_space<vmem>>, vector<8x128xf32>,
    %c0_1 = arith.constant 0 : index
    %c0_2 = arith.constant 0 : index
    %2 = vector.load %arg7[%c0_1, %c0_2] : memref<8x640xf32, #tpu.memory_space<vmem>>, vector<8x128xf32>
    tpu.vector_store %arg7[%c0_1, %c0_2], %0 {strides = array<i32>} : memref<8x640xf32, #tpu.memory_space<vmem>>, vector<8x128xf32>,
    %c0_3 = arith.constant 0 : index
    %c0_4 = arith.constant 0 : index
    %c0_5 = arith.constant 0 : index
    %3 = vector.load %arg1[%c0_3, %c0_4, %c0_5] : memref<1x8x512xf32, #tpu.memory_space<vmem>>, vector<1x8x512xf32>
    %4 = vector.shape_cast %3 : vector<1x8x512xf32> to vector<8x512xf32>
    %c0_6 = arith.constant 0 : index
    %c128 = arith.constant 128 : index
    %5 = vector.load %arg6[%c0_6, %c128] : memref<8x640xf32, #tpu.memory_space<vmem>>, vector<8x512xf32>
    tpu.vector_store %arg6[%c0_6, %c128], %4 {strides = array<i32>} : memref<8x640xf32, #tpu.memory_space<vmem>>, vector<8x512xf32>,
    %c0_7 = arith.constant 0 : index
    %c0_8 = arith.constant 0 : index
    %c0_9 = arith.constant 0 : index
    %c0_10 = arith.constant 0 : index
    %6 = vector.load %arg2[%c0_7, %c0_8, %c0_9, %c0_10] : memref<3x4x8x8xf32, #tpu.memory_space<vmem>>, vector<1x1x8x8xf32>
    %7 = vector.shape_cast %6 : vector<1x1x8x8xf32> to vector<8x8xf32>
    %c0_11 = arith.constant 0 : index
    %c128_12 = arith.constant 128 : index
    %8 = vector.load %arg6[%c0_11, %c128_12] : memref<8x640xf32, #tpu.memory_space<vmem>>, vector<8x512xf32>
    %cst_13 = arith.constant dense<0.000000e+00> : vector<8x512xf32>
    %9 = tpu.matmul %7, %8, %cst_13 {dimension_numbers = #tpu.dot_dimension_numbers<[1], [0], [0], [1], [0, 0, 1, 1], [], []>} : vector<8x8xf32>, vector<8x512xf32>, vector<8x512xf32> -> vector<8x512xf32>
    %c0_14 = arith.constant 0 : index
    %c1 = arith.constant 1 : index
    %c0_15 = arith.constant 0 : index
    %c0_16 = arith.constant 0 : index
    %10 = vector.load %arg2[%c0_14, %c1, %c0_15, %c0_16] : memref<3x4x8x8xf32, #tpu.memory_space<vmem>>, vector<1x1x8x8xf32>
    %11 = vector.shape_cast %10 : vector<1x1x8x8xf32> to vector<8x8xf32>
    %c0_17 = arith.constant 0 : index
    %c127 = arith.constant 127 : index
    %12 = vector.load %arg6[%c0_17, %c127] : memref<8x640xf32, #tpu.memory_space<vmem>>, vector<8x512xf32>
    %cst_18 = arith.constant dense<0.000000e+00> : vector<8x512xf32>
    %13 = tpu.matmul %11, %12, %cst_18 {dimension_numbers = #tpu.dot_dimension_numbers<[1], [0], [0], [1], [0, 0, 1, 1], [], []>} : vector<8x8xf32>, vector<8x512xf32>, vector<8x512xf32> -> vector<8x512xf32>
    %14 = arith.addf %9, %13 : vector<8x512xf32>
    %c0_19 = arith.constant 0 : index
    %c2 = arith.constant 2 : index
    %c0_20 = arith.constant 0 : index
    %c0_21 = arith.constant 0 : index
    %15 = vector.load %arg2[%c0_19, %c2, %c0_20, %c0_21] : memref<3x4x8x8xf32, #tpu.memory_space<vmem>>, vector<1x1x8x8xf32>
    %16 = vector.shape_cast %15 : vector<1x1x8x8xf32> to vector<8x8xf32>
    %c0_22 = arith.constant 0 : index
    %c108 = arith.constant 108 : index
    %17 = vector.load %arg6[%c0_22, %c108] : memref<8x640xf32, #tpu.memory_space<vmem>>, vector<8x512xf32>
    %cst_23 = arith.constant dense<0.000000e+00> : vector<8x512xf32>
    %18 = tpu.matmul %16, %17, %cst_23 {dimension_numbers = #tpu.dot_dimension_numbers<[1], [0], [0], [1], [0, 0, 1, 1], [], []>} : vector<8x8xf32>, vector<8x512xf32>, vector<8x512xf32> -> vector<8x512xf32>
    %19 = arith.addf %14, %18 : vector<8x512xf32>
    %c0_24 = arith.constant 0 : index
    %c3 = arith.constant 3 : index
    %c0_25 = arith.constant 0 : index
    %c0_26 = arith.constant 0 : index
    %20 = vector.load %arg2[%c0_24, %c3, %c0_25, %c0_26] : memref<3x4x8x8xf32, #tpu.memory_space<vmem>>, vector<1x1x8x8xf32>
    %21 = vector.shape_cast %20 : vector<1x1x8x8xf32> to vector<8x8xf32>
    %c0_27 = arith.constant 0 : index
    %c107 = arith.constant 107 : index
    %22 = vector.load %arg6[%c0_27, %c107] : memref<8x640xf32, #tpu.memory_space<vmem>>, vector<8x512xf32>
    %cst_28 = arith.constant dense<0.000000e+00> : vector<8x512xf32>
    %23 = tpu.matmul %21, %22, %cst_28 {dimension_numbers = #tpu.dot_dimension_numbers<[1], [0], [0], [1], [0, 0, 1, 1], [], []>} : vector<8x8xf32>, vector<8x512xf32>, vector<8x512xf32> -> vector<8x512xf32>
    %24 = arith.addf %19, %23 : vector<8x512xf32>
    %c0_29 = arith.constant 0 : index
    %c0_30 = arith.constant 0 : index
    %c0_31 = arith.constant 0 : index
    %25 = vector.load %arg3[%c0_29, %c0_30, %c0_31] : memref<3x8x1xf32, #tpu.memory_space<vmem>>, vector<1x8x1xf32>
    %26 = vector.shape_cast %25 : vector<1x8x1xf32> to vector<8x1xf32>
    %27 = vector.broadcast %26 : vector<8x1xf32> to vector<8x512xf32>
    %28 = arith.addf %24, %27 : vector<8x512xf32>
    %cst_32 = arith.constant 0.000000e+00 : f32
    %29 = vector.broadcast %cst_32 : f32 to vector<8x512xf32>
    %30 = arith.cmpf oge, %28, %29 : vector<8x512xf32>
    %cst_33 = arith.constant 0.00999999977 : f32
    %31 = vector.broadcast %cst_33 : f32 to vector<8x512xf32>
    %32 = arith.mulf %31, %28 : vector<8x512xf32>
    %33 = arith.select %30, %28, %32 : vector<8x512xi1>, vector<8x512xf32>
    %c0_34 = arith.constant 0 : index
    %c0_35 = arith.constant 0 : index
    %c0_36 = arith.constant 0 : index
    %34 = vector.load %arg4[%c0_34, %c0_35, %c0_36] : memref<2x1x512xf32, #tpu.memory_space<vmem>>, vector<1x1x512xf32>
    %35 = vector.shape_cast %34 : vector<1x1x512xf32> to vector<1x512xf32>
    %36 = vector.broadcast %35 : vector<1x512xf32> to vector<8x512xf32>
    %37 = arith.mulf %33, %36 : vector<8x512xf32>
    %c0_37 = arith.constant 0 : index
    %c128_38 = arith.constant 128 : index
    %38 = vector.load %arg7[%c0_37, %c128_38] : memref<8x640xf32, #tpu.memory_space<vmem>>, vector<8x512xf32>
    tpu.vector_store %arg7[%c0_37, %c128_38], %37 {strides = array<i32>} : memref<8x640xf32, #tpu.memory_space<vmem>>, vector<8x512xf32>,
    %c1_39 = arith.constant 1 : index
    %c0_40 = arith.constant 0 : index
    %c0_41 = arith.constant 0 : index
    %c0_42 = arith.constant 0 : index
    %39 = vector.load %arg2[%c1_39, %c0_40, %c0_41, %c0_42] : memref<3x4x8x8xf32, #tpu.memory_space<vmem>>, vector<1x1x8x8xf32>
    %40 = vector.shape_cast %39 : vector<1x1x8x8xf32> to vector<8x8xf32>
    %c0_43 = arith.constant 0 : index
    %c128_44 = arith.constant 128 : index
    %41 = vector.load %arg7[%c0_43, %c128_44] : memref<8x640xf32, #tpu.memory_space<vmem>>, vector<8x512xf32>
    %cst_45 = arith.constant dense<0.000000e+00> : vector<8x512xf32>
    %42 = tpu.matmul %40, %41, %cst_45 {dimension_numbers = #tpu.dot_dimension_numbers<[1], [0], [0], [1], [0, 0, 1, 1], [], []>} : vector<8x8xf32>, vector<8x512xf32>, vector<8x512xf32> -> vector<8x512xf32>
    %c1_46 = arith.constant 1 : index
    %c1_47 = arith.constant 1 : index
    %c0_48 = arith.constant 0 : index
    %c0_49 = arith.constant 0 : index
    %43 = vector.load %arg2[%c1_46, %c1_47, %c0_48, %c0_49] : memref<3x4x8x8xf32, #tpu.memory_space<vmem>>, vector<1x1x8x8xf32>
    %44 = vector.shape_cast %43 : vector<1x1x8x8xf32> to vector<8x8xf32>
    %c0_50 = arith.constant 0 : index
    %c127_51 = arith.constant 127 : index
    %45 = vector.load %arg7[%c0_50, %c127_51] : memref<8x640xf32, #tpu.memory_space<vmem>>, vector<8x512xf32>
    %cst_52 = arith.constant dense<0.000000e+00> : vector<8x512xf32>
    %46 = tpu.matmul %44, %45, %cst_52 {dimension_numbers = #tpu.dot_dimension_numbers<[1], [0], [0], [1], [0, 0, 1, 1], [], []>} : vector<8x8xf32>, vector<8x512xf32>, vector<8x512xf32> -> vector<8x512xf32>
    %47 = arith.addf %42, %46 : vector<8x512xf32>
    %c1_53 = arith.constant 1 : index
    %c2_54 = arith.constant 2 : index
    %c0_55 = arith.constant 0 : index
    %c0_56 = arith.constant 0 : index
    %48 = vector.load %arg2[%c1_53, %c2_54, %c0_55, %c0_56] : memref<3x4x8x8xf32, #tpu.memory_space<vmem>>, vector<1x1x8x8xf32>
    %49 = vector.shape_cast %48 : vector<1x1x8x8xf32> to vector<8x8xf32>
    %c0_57 = arith.constant 0 : index
    %c108_58 = arith.constant 108 : index
    %50 = vector.load %arg7[%c0_57, %c108_58] : memref<8x640xf32, #tpu.memory_space<vmem>>, vector<8x512xf32>
    %cst_59 = arith.constant dense<0.000000e+00> : vector<8x512xf32>
    %51 = tpu.matmul %49, %50, %cst_59 {dimension_numbers = #tpu.dot_dimension_numbers<[1], [0], [0], [1], [0, 0, 1, 1], [], []>} : vector<8x8xf32>, vector<8x512xf32>, vector<8x512xf32> -> vector<8x512xf32>
    %52 = arith.addf %47, %51 : vector<8x512xf32>
    %c1_60 = arith.constant 1 : index
    %c3_61 = arith.constant 3 : index
    %c0_62 = arith.constant 0 : index
    %c0_63 = arith.constant 0 : index
    %53 = vector.load %arg2[%c1_60, %c3_61, %c0_62, %c0_63] : memref<3x4x8x8xf32, #tpu.memory_space<vmem>>, vector<1x1x8x8xf32>
    %54 = vector.shape_cast %53 : vector<1x1x8x8xf32> to vector<8x8xf32>
    %c0_64 = arith.constant 0 : index
    %c107_65 = arith.constant 107 : index
    %55 = vector.load %arg7[%c0_64, %c107_65] : memref<8x640xf32, #tpu.memory_space<vmem>>, vector<8x512xf32>
    %cst_66 = arith.constant dense<0.000000e+00> : vector<8x512xf32>
    %56 = tpu.matmul %54, %55, %cst_66 {dimension_numbers = #tpu.dot_dimension_numbers<[1], [0], [0], [1], [0, 0, 1, 1], [], []>} : vector<8x8xf32>, vector<8x512xf32>, vector<8x512xf32> -> vector<8x512xf32>
    %57 = arith.addf %52, %56 : vector<8x512xf32>
    %c1_67 = arith.constant 1 : index
    %c0_68 = arith.constant 0 : index
    %c0_69 = arith.constant 0 : index
    %58 = vector.load %arg3[%c1_67, %c0_68, %c0_69] : memref<3x8x1xf32, #tpu.memory_space<vmem>>, vector<1x8x1xf32>
    %59 = vector.shape_cast %58 : vector<1x8x1xf32> to vector<8x1xf32>
    %60 = vector.broadcast %59 : vector<8x1xf32> to vector<8x512xf32>
    %61 = arith.addf %57, %60 : vector<8x512xf32>
    %cst_70 = arith.constant 0.000000e+00 : f32
    %62 = vector.broadcast %cst_70 : f32 to vector<8x512xf32>
    %63 = arith.cmpf oge, %61, %62 : vector<8x512xf32>
    %cst_71 = arith.constant 0.00999999977 : f32
    %64 = vector.broadcast %cst_71 : f32 to vector<8x512xf32>
    %65 = arith.mulf %64, %61 : vector<8x512xf32>
    %66 = arith.select %63, %61, %65 : vector<8x512xi1>, vector<8x512xf32>
    %c1_72 = arith.constant 1 : index
    %c0_73 = arith.constant 0 : index
    %c0_74 = arith.constant 0 : index
    %67 = vector.load %arg4[%c1_72, %c0_73, %c0_74] : memref<2x1x512xf32, #tpu.memory_space<vmem>>, vector<1x1x512xf32>
    %68 = vector.shape_cast %67 : vector<1x1x512xf32> to vector<1x512xf32>
    %69 = vector.broadcast %68 : vector<1x512xf32> to vector<8x512xf32>
    %70 = arith.mulf %66, %69 : vector<8x512xf32>
    %c0_75 = arith.constant 0 : index
    %c128_76 = arith.constant 128 : index
    %71 = vector.load %arg6[%c0_75, %c128_76] : memref<8x640xf32, #tpu.memory_space<vmem>>, vector<8x512xf32>
    tpu.vector_store %arg6[%c0_75, %c128_76], %70 {strides = array<i32>} : memref<8x640xf32, #tpu.memory_space<vmem>>, vector<8x512xf32>,
    %c2_77 = arith.constant 2 : index
    %c0_78 = arith.constant 0 : index
    %c0_79 = arith.constant 0 : index
    %c0_80 = arith.constant 0 : index
    %72 = vector.load %arg2[%c2_77, %c0_78, %c0_79, %c0_80] : memref<3x4x8x8xf32, #tpu.memory_space<vmem>>, vector<1x1x8x8xf32>
    %73 = vector.shape_cast %72 : vector<1x1x8x8xf32> to vector<8x8xf32>
    %c0_81 = arith.constant 0 : index
    %c128_82 = arith.constant 128 : index
    %74 = vector.load %arg6[%c0_81, %c128_82] : memref<8x640xf32, #tpu.memory_space<vmem>>, vector<8x512xf32>
    %cst_83 = arith.constant dense<0.000000e+00> : vector<8x512xf32>
    %75 = tpu.matmul %73, %74, %cst_83 {dimension_numbers = #tpu.dot_dimension_numbers<[1], [0], [0], [1], [0, 0, 1, 1], [], []>} : vector<8x8xf32>, vector<8x512xf32>, vector<8x512xf32> -> vector<8x512xf32>
    %c2_84 = arith.constant 2 : index
    %c1_85 = arith.constant 1 : index
    %c0_86 = arith.constant 0 : index
    %c0_87 = arith.constant 0 : index
    %76 = vector.load %arg2[%c2_84, %c1_85, %c0_86, %c0_87] : memref<3x4x8x8xf32, #tpu.memory_space<vmem>>, vector<1x1x8x8xf32>
    %77 = vector.shape_cast %76 : vector<1x1x8x8xf32> to vector<8x8xf32>
    %c0_88 = arith.constant 0 : index
    %c127_89 = arith.constant 127 : index
    %78 = vector.load %arg6[%c0_88, %c127_89] : memref<8x640xf32, #tpu.memory_space<vmem>>, vector<8x512xf32>
    %cst_90 = arith.constant dense<0.000000e+00> : vector<8x512xf32>
    %79 = tpu.matmul %77, %78, %cst_90 {dimension_numbers = #tpu.dot_dimension_numbers<[1], [0], [0], [1], [0, 0, 1, 1], [], []>} : vector<8x8xf32>, vector<8x512xf32>, vector<8x512xf32> -> vector<8x512xf32>
    %80 = arith.addf %75, %79 : vector<8x512xf32>
    %c2_91 = arith.constant 2 : index
    %c2_92 = arith.constant 2 : index
    %c0_93 = arith.constant 0 : index
    %c0_94 = arith.constant 0 : index
    %81 = vector.load %arg2[%c2_91, %c2_92, %c0_93, %c0_94] : memref<3x4x8x8xf32, #tpu.memory_space<vmem>>, vector<1x1x8x8xf32>
    %82 = vector.shape_cast %81 : vector<1x1x8x8xf32> to vector<8x8xf32>
    %c0_95 = arith.constant 0 : index
    %c108_96 = arith.constant 108 : index
    %83 = vector.load %arg6[%c0_95, %c108_96] : memref<8x640xf32, #tpu.memory_space<vmem>>, vector<8x512xf32>
    %cst_97 = arith.constant dense<0.000000e+00> : vector<8x512xf32>
    %84 = tpu.matmul %82, %83, %cst_97 {dimension_numbers = #tpu.dot_dimension_numbers<[1], [0], [0], [1], [0, 0, 1, 1], [], []>} : vector<8x8xf32>, vector<8x512xf32>, vector<8x512xf32> -> vector<8x512xf32>
    %85 = arith.addf %80, %84 : vector<8x512xf32>
    %c2_98 = arith.constant 2 : index
    %c3_99 = arith.constant 3 : index
    %c0_100 = arith.constant 0 : index
    %c0_101 = arith.constant 0 : index
    %86 = vector.load %arg2[%c2_98, %c3_99, %c0_100, %c0_101] : memref<3x4x8x8xf32, #tpu.memory_space<vmem>>, vector<1x1x8x8xf32>
    %87 = vector.shape_cast %86 : vector<1x1x8x8xf32> to vector<8x8xf32>
    %c0_102 = arith.constant 0 : index
    %c107_103 = arith.constant 107 : index
    %88 = vector.load %arg6[%c0_102, %c107_103] : memref<8x640xf32, #tpu.memory_space<vmem>>, vector<8x512xf32>
    %cst_104 = arith.constant dense<0.000000e+00> : vector<8x512xf32>
    %89 = tpu.matmul %87, %88, %cst_104 {dimension_numbers = #tpu.dot_dimension_numbers<[1], [0], [0], [1], [0, 0, 1, 1], [], []>} : vector<8x8xf32>, vector<8x512xf32>, vector<8x512xf32> -> vector<8x512xf32>
    %90 = arith.addf %85, %89 : vector<8x512xf32>
    %c2_105 = arith.constant 2 : index
    %c0_106 = arith.constant 0 : index
    %c0_107 = arith.constant 0 : index
    %91 = vector.load %arg3[%c2_105, %c0_106, %c0_107] : memref<3x8x1xf32, #tpu.memory_space<vmem>>, vector<1x8x1xf32>
    %92 = vector.shape_cast %91 : vector<1x8x1xf32> to vector<8x1xf32>
    %93 = vector.broadcast %92 : vector<8x1xf32> to vector<8x512xf32>
    %94 = arith.addf %90, %93 : vector<8x512xf32>
    %c0_108 = arith.constant 0 : index
    %c0_109 = arith.constant 0 : index
    %c0_110 = arith.constant 0 : index
    %95 = vector.load %arg5[%c0_108, %c0_109, %c0_110] : memref<1x8x512xf32, #tpu.memory_space<vmem>>, vector<1x8x512xf32>
    %96 = vector.shape_cast %95 : vector<1x8x512xf32> to vector<8x512xf32>
    %97 = vector.shape_cast %94 : vector<8x512xf32> to vector<1x8x512xf32>
    tpu.vector_store %arg5[%c0_108, %c0_109, %c0_110], %97 {strides = array<i32>} : memref<1x8x512xf32, #tpu.memory_space<vmem>>, vector<1x8x512xf32>,
    return
  }
  func.func @transform_0(%arg0: i32) -> (i32, i32, i32) {
    %c0_i32 = arith.constant 0 : i32
    %c0_i32_0 = arith.constant 0 : i32
    %c0_i32_1 = arith.constant 0 : i32
    return %arg0, %c0_i32, %c0_i32_0 : i32, i32, i32
  }
  func.func @transform_1(%arg0: i32) -> (i32, i32, i32, i32) {
    %c0_i32 = arith.constant 0 : i32
    %c0_i32_0 = arith.constant 0 : i32
    %c0_i32_1 = arith.constant 0 : i32
    %c0_i32_2 = arith.constant 0 : i32
    %c0_i32_3 = arith.constant 0 : i32
    return %c0_i32, %c0_i32_0, %c0_i32_1, %c0_i32_2 : i32, i32, i32, i32
  }
  func.func @transform_2(%arg0: i32) -> (i32, i32, i32) {
    %c0_i32 = arith.constant 0 : i32
    %c0_i32_0 = arith.constant 0 : i32
    %c0_i32_1 = arith.constant 0 : i32
    %c0_i32_2 = arith.constant 0 : i32
    return %c0_i32, %c0_i32_0, %c0_i32_1 : i32, i32, i32
  }
  func.func @transform_3(%arg0: i32) -> (i32, i32, i32) {
    %c0_i32 = arith.constant 0 : i32
    %c0_i32_0 = arith.constant 0 : i32
    %c0_i32_1 = arith.constant 0 : i32
    %c0_i32_2 = arith.constant 0 : i32
    return %c0_i32, %c0_i32_0, %c0_i32_1 : i32, i32, i32
  }
  func.func @transform_4(%arg0: i32) -> (i32, i32, i32) {
    %c0_i32 = arith.constant 0 : i32
    %c0_i32_0 = arith.constant 0 : i32
    %c0_i32_1 = arith.constant 0 : i32
    return %arg0, %c0_i32, %c0_i32_0 : i32, i32, i32
  }
}

</mosaic_0001>

<bundles_post_ra>
// kernel: cnn_forward.1
= control target key start
LH: loop header
LB: loop body
LE: loop exit
PB: predicated region body
PF: predicated region fallthrough
CT: control target
= control target key end

     0   :  { %s2507_s15 = smov 0   ;;  %s2742_s0 = inlined_call_operand.vmem [shape: f32[2,8,512], index: 0, kind: input, shape index: {}]   ;;  %s2743_s1 = inlined_call_operand.vmem [shape: f32[3,4,8,8], index: 1, kind: input, shape index: {}]   ;;  %s2744_s2 = inlined_call_operand.vmem [shape: f32[3,8,1], index: 2, kind: input, shape index: {}]   ;;  %s2745_s3 = inlined_call_operand.vmem [shape: f32[2,1,512], index: 3, kind: input, shape index: {}]   ;;  %s2746_s4 = inlined_call_operand.vmem [shape: f32[2,8,512], index: 4, kind: output, shape index: {}]  }
   0x1 LB: > { %s2367_s16 = sadd.s32 4294967295, %s2475_s15   ;;  %p2371_p0 = scmp.ge.s32.totalorder %s2475_s15, 1  ;;  %s2475_s15 = sphi %s2507_s15, %s14_s15  }
   0x2   : > { %p162_p1 = scmp.lt.s32.totalorder %s2475_s15, 3 }
   0x4   : > { %p163_p2 = pnand %p2371_p0, %p162_p1 }
   0x5   : > { %p188_p3 = scmp.lt.s32.totalorder (!%p163_p2), %s2367_s16, 1  ;;  %v2477_v0 = vmov (!%p163_p2), 0.0   ;;  %s2478_s21 = smov (!%p163_p2), 1   ;;  %v2481_v5 = vmov (!%p163_p2), 0   ;;  %v871_v6 = vld [vmem:[%s2744_s2] sm:$0xff] (!%p163_p2)  ;;  %vm231_vm0 = vcmask (!%p163_p2), 7168   ;;  %v895_v38 = vlaneseq (!%p163_p2) }
   0x6   : > { %166 = sbr.rel (%p163_p2) target bundleno = 1118 (0x45e), region = 36  ;;  %379 = vmatprep.mubr.f32.mxu1 (!%p163_p2), %v2477_v0  ;;  %308 = vmatprep.mubr.f32.mxu0 (!%p163_p2), %v2477_v0  ;;  %s2479_s22 = smov (!%p163_p2), 20   ;;  %v2376_v14 = vld [vmem:[%s2743_s1 + $0x8] sm:$0xff] (!%p163_p2)  ;;  %vm240_vm1 = vcmask (!%p163_p2), 64512   ;;  %vm543_vm2 = vcmask (!%p163_p2), 162816   ;;  %v208_v21 = vld [vmem:[%s2743_s1] sm:$0xff] (!%p163_p2) }
   0x7   : > { %s2480_s23 = smov (!%p163_p2), 21   ;;  %2467 = vset.pattern.permute.xlu1 (!%p163_p2), %v2481_v5  ;;  %2468 = vset.pattern.permute.xlu0 (!%p163_p2), %v2481_v5  ;;  %vm713_vm3 = vcmask (!%p163_p2), 171008   ;;  %v2381_v30 = vld [vmem:[%s2743_s1 + $0x10] sm:$0xff] (!%p163_p2)  ;;  %v2384_v37 = vld [vmem:[%s2743_s1 + $0x18] sm:$0xff] (!%p163_p2)  ;;  %v2586_v40 = vshrl.u32 (!%p163_p2), %v895_v38, 7 }
   0x8   : > { %v893_v48 = vld [vmem:[%s2745_s3] sm:$0xf] (!%p163_p2)  ;;  %v2396_v38 = vld [vmem:[%s2743_s1 + $0x38] sm:$0xff] (!%p163_p2) }
   0x9   : > { %v897_v43 = vsub.s32 (!%p163_p2), 0, %v2586_v40  ;;  %v901_v45 = vsub.s32 (!%p163_p2), 1, %v2586_v40  ;;  %v905_v51 = vsub.s32 (!%p163_p2), 2, %v2586_v40  ;;  %v909_v52 = vsub.s32 (!%p163_p2), 3, %v2586_v40  ;;  %v2413_v40 = vld [vmem:[%s2744_s2 + $0x10] sm:$0xff] (!%p163_p2) }
   0xb   : > { %v898_v53 = vrot.slane (!%p163_p2), %v893_v48, %v897_v43  ;;  %v902_v57 = vrot.slane (!%p163_p2), %v893_v48, %v901_v45  ;;  %v906_v61 = vrot.slane (!%p163_p2), %v893_v48, %v905_v51 }
   0xd   : > { %s2748_s16 = smov (!%p188_p3, %s2367_s16), 1 }
   0xe   : > { %s2416_s17 = sshll.u32 %s2748_s16, 5 }
   0xf   : > { %s192_s20 = scalar_lea.vmem %s2742_s0, %s2416_s17  ;;  %s197_s11 = scalar_lea.vmem %s2746_s4, %s2416_s17 }
  0x10   : > { %v202_v1 = vld [vmem:[%s192_s20 + $0x10] sm:$0xff]  ;;  %v200_v2 = vld [vmem:[%s192_s20] sm:$0xff]  ;;  %v203_v3 = vld [vmem:[%s192_s20 + $0x18] sm:$0xff] }
  0x11   : > { %227 = vrot.lane.b32.xlu1 %v202_v1, %s2478_s21  ;;  %223 = vrot.lane.b32.xlu0 %v200_v2, %s2478_s21  ;;  %v201_v4 = vld [vmem:[%s192_s20 + $0x8] sm:$0xff] }
  0x15   : > { %229 = vrot.lane.b32.xlu1 %v203_v3, %s2478_s21  ;;  %225 = vrot.lane.b32.xlu0 %v201_v4, %s2478_s21 }
  0x19   : > { %535 = vrot.lane.b32.xlu1 %v200_v2, %s2479_s22  ;;  %221 = vrot.lane.b32.xlu0 %v2477_v0, %s2478_s21 }
  0x1d   : > { %539 = vrot.lane.b32.xlu1 %v202_v1, %s2479_s22  ;;  %537 = vrot.lane.b32.xlu0 %v201_v4, %s2479_s22 }
  0x21   : > { %533 = vrot.lane.b32.xlu1 %v2477_v0, %s2479_s22  ;;  %541 = vrot.lane.b32.xlu0 %v203_v3, %s2479_s22 }
  0x25   : > { %707 = vrot.lane.b32.xlu1 %v201_v4, %s2480_s23  ;;  %705 = vrot.lane.b32.xlu0 %v200_v2, %s2480_s23 }
  0x29   : > { %711 = vrot.lane.b32.xlu1 %v203_v3, %s2480_s23  ;;  %709 = vrot.lane.b32.xlu0 %v202_v1, %s2480_s23 }
  0x2d   : > { %703 = vrot.lane.b32.xlu0 %v2477_v0, %s2480_s23  ;;  %874 = vperm.xlu1 %2467, %v871_v6  }
  0x83   : > { %v228_v7 = vpop.permute.xlu1 %227  ;;  %v224_v8 = vpop.permute.xlu0 %223 }
  0x87   : > { %v230_v9 = vpop.permute.xlu1 %229  ;;  %v226_v10 = vpop.permute.xlu0 %225 }
  0x88   : > { %v233_v11 = vsel %vm231_vm0, %v224_v8, %v226_v10  ;;  %v235_v12 = vsel %vm231_vm0, %v228_v7, %v230_v9  ;;  %v234_v13 = vsel %vm231_vm0, %v226_v10, %v228_v7  ;;  %v2399_v7 = vld [vmem:[%s2744_s2 + $0x8] sm:$0xff] }
  0x89   : > { %244 = vmatprep.subr.mxu0 %v233_v11  ;;  %315 = vmatprep.subr.mxu1 %v235_v12 }
  0x8a   : > { %316 = vmatpush1.msra.mxu1 %v234_v13 }
  0x8b   : > { %v536_v15 = vpop.permute.xlu1 %535  ;;  %2378 = vmatmul.mubr.msk.f32.vlgmr.msra.gmra.mrb[0].mxu1 %vm240_vm1, %v2376_v14  ;;  %v222_v16 = vpop.permute.xlu0 %221  ;;  %460 = vmatprep.subr.mxu1 %v203_v3 }
  0x8c   : > { %v232_v17 = vsel %vm231_vm0, %v222_v16, %v224_v8  ;;  %461 = vmatpush1.msra.mxu1 %v202_v1  ;;  %524 = vmatprep.mubr.f32.mxu1 %v2477_v0 }
  0x8d   : > { %245 = vmatpush1.msra.mxu0 %v232_v17 }
  0x8e   : > { %2377 = vmatmul.mubr.msk.f32.vlgmr.msra.gmra.mrb[0].mxu0 %vm240_vm1, %v2376_v14  ;;  %389 = vmatprep.subr.mxu0 %v201_v4  ;;  %v2388_v14 = vld [vmem:[%s2743_s1 + $0x28] sm:$0xff] }
  0x8f   : > { %v540_v18 = vpop.permute.xlu1 %539  ;;  %v538_v19 = vpop.permute.xlu0 %537  ;;  %390 = vmatpush1.msra.mxu0 %v200_v2  ;;  %453 = vmatprep.mubr.f32.mxu0 %v2477_v0  ;;  %v910_v2 = vrot.slane %v893_v48, %v909_v52  ;;  %v2400_v48 = vld [vmem:[%s2745_s3 + $0x4] sm:$0xf] }
  0x90   : > { %v545_v20 = vsel %vm543_vm2, %v536_v15, %v538_v19  ;;  %v546_v22 = vsel %vm543_vm2, %v538_v19, %v540_v18 }
  0x91   : > { %555 = vmatprep.subr.mxu0 %v545_v20 }
  0x93   : > { %v534_v23 = vpop.permute.xlu1 %533  ;;  %2380 = vmatmul.mubr.msk.f32.vlgmr.msra.gmra.mrb[0].mxu1 %vm240_vm1, %v208_v21  ;;  %v542_v24 = vpop.permute.xlu0 %541 }
  0x94   : > { %v544_v25 = vsel %vm543_vm2, %v534_v23, %v536_v15  ;;  %v547_v26 = vsel %vm543_vm2, %v540_v18, %v542_v24  ;;  %690 = vmatprep.mubr.f32.mxu1 %v2477_v0 }
  0x95   : > { %626 = vmatprep.subr.mxu1 %v547_v26 }
  0x96   : > { %2379 = vmatmul.mubr.msk.f32.vlgmr.msra.gmra.mrb[0].mxu0 %vm240_vm1, %v208_v21  ;;  %627 = vmatpush1.msra.mxu1 %v546_v22  ;;  %v2387_v22 = vld [vmem:[%s2743_s1 + $0x20] sm:$0xff] }
  0x97   : > { %556 = vmatpush1.msra.mxu0 %v544_v25  ;;  %v708_v27 = vpop.permute.xlu1 %707  ;;  %v706_v28 = vpop.permute.xlu0 %705  ;;  %619 = vmatprep.mubr.f32.mxu0 %v2477_v0 }
  0x98   : > { %v715_v29 = vsel %vm713_vm3, %v706_v28, %v708_v27 }
  0x99   : > { %725 = vmatprep.subr.mxu0 %v715_v29 }
  0x9b   : > { %v712_v31 = vpop.permute.xlu1 %711  ;;  %2383 = vmatmul.mubr.msk.f32.vlgmr.msra.gmra.mrb[0].mxu1 %vm240_vm1, %v2381_v30  ;;  %v710_v32 = vpop.permute.xlu0 %709 }
  0x9c   : > { %v716_v33 = vsel %vm713_vm3, %v708_v27, %v710_v32  ;;  %v717_v34 = vsel %vm713_vm3, %v710_v32, %v712_v31  ;;  %860 = vmatprep.mubr.f32.mxu1 %v2477_v0  ;;  %v2393_v31 = vld [vmem:[%s2743_s1 + $0x30] sm:$0xff] }
  0x9d   : > { %796 = vmatprep.subr.mxu1 %v717_v34 }
  0x9e   : > { %2382 = vmatmul.mubr.msk.f32.vlgmr.msra.gmra.mrb[0].mxu0 %vm240_vm1, %v2381_v30  ;;  %797 = vmatpush1.msra.mxu1 %v716_v33 }
  0x9f   : > { %v704_v35 = vpop.permute.xlu0 %703  ;;  %789 = vmatprep.mubr.f32.mxu0 %v2477_v0 }
  0xa0   : > { %v714_v36 = vsel %vm713_vm3, %v704_v35, %v706_v28 }
  0xa1   : > { %726 = vmatpush1.msra.mxu0 %v714_v36 }
  0xa3   : > { %2386 = vmatmul.mubr.msk.f32.vlgmr.msra.gmra.mrb[0].mxu1 %vm240_vm1, %v2384_v37 }
  0xa4   : > { %1093 = vmatprep.mubr.f32.mxu1 %v2477_v0 }
  0xa6   : > { %2385 = vmatmul.mubr.msk.f32.vlgmr.msra.gmra.mrb[0].mxu0 %vm240_vm1, %v2384_v37 }
  0xa7   : > { %1022 = vmatprep.mubr.f32.mxu0 %v2477_v0 }
  0xac   : > { %v875_v39 = vpop.permute.xlu1 %874 }
 0x176   : > { %v862_v41 = vpop.f32.mrb[0].mxu1 }
 0x177   : > { %v864_v42 = vpop.f32.mrb[1].mxu1  ;;  %v879_v44 = vadd.f32 %v875_v39, %v862_v41 }
 0x178   : > { %v880_v46 = vadd.f32 %v875_v39, %v864_v42 }
 0x179   : > { %v791_v47 = vpop.f32.mrb[0].mxu0  ;;  %v887_v55 = vmul.f32 0.01, %v879_v44  ;;  %vm883_vm5 = vcmp.ge.f32.partialorder %v879_v44, 0.0 }
 0x17a   : > { %v877_v49 = vadd.f32 %v875_v39, %v791_v47  ;;  %v793_v50 = vpop.f32.mrb[1].mxu0  ;;  %v888_v58 = vmul.f32 0.01, %v880_v46  ;;  %vm884_vm7 = vcmp.ge.f32.partialorder %v880_v46, 0.0 }
 0x17b   : > { %v878_v54 = vadd.f32 %v875_v39, %v793_v50  ;;  %v891_v1 = vsel %vm883_vm5, %v879_v44, %v887_v55 }
 0x17c   : > { %vm881_vm4 = vcmp.ge.f32.partialorder %v877_v49, 0.0  ;;  %v885_v56 = vmul.f32 0.01, %v877_v49  ;;  %v892_v4 = vsel %vm884_vm7, %v880_v46, %v888_v58  ;;  %v917_v5 = vmul.f32 %v906_v61, %v891_v1 }
 0x17d   : > { %vm882_vm6 = vcmp.ge.f32.partialorder %v878_v54, 0.0  ;;  %v886_v59 = vmul.f32 0.01, %v878_v54  ;;  %v918_v6 = vmul.f32 %v910_v2, %v892_v4  ;;  %v1620_v61 = vrot.slane %v2400_v48, %v905_v51 }
 0x17e   : > { %v889_v60 = vsel %vm881_vm4, %v877_v49, %v885_v56 }
 0x17f   : > { %v915_v62 = vmul.f32 %v898_v53, %v889_v60  ;;  %v890_v63 = vsel %vm882_vm6, %v878_v54, %v886_v59  ;;  %v1612_v53 = vrot.slane %v2400_v48, %v897_v43  ;;  %v1624_v43 = vrot.slane %v2400_v48, %v909_v52 }
 0x180   : > { %v916_v3 = vmul.f32 %v902_v57, %v890_v63  ;;  %v1616_v57 = vrot.slane %v2400_v48, %v901_v45 }
 0x181   : > { %939 = vrot.lane.b32.xlu0 %v915_v62, %s2478_s21 }
 0x182   : > { %941 = vrot.lane.b32.xlu1 %v916_v3, %s2478_s21 }
 0x185   : > { %943 = vrot.lane.b32.xlu0 %v917_v5, %s2478_s21 }
 0x186   : > { %945 = vrot.lane.b32.xlu1 %v918_v6, %s2478_s21 }
 0x189   : > { %937 = vrot.lane.b32.xlu0 %v2477_v0, %s2478_s21 }
 0x18a   : > { %1249 = vrot.lane.b32.xlu1 %v915_v62, %s2479_s22 }
 0x18d   : > { %1251 = vrot.lane.b32.xlu0 %v916_v3, %s2479_s22 }
 0x18e   : > { %1253 = vrot.lane.b32.xlu1 %v917_v5, %s2479_s22 }
 0x191   : > { %1255 = vrot.lane.b32.xlu0 %v918_v6, %s2479_s22 }
 0x192   : > { %1247 = vrot.lane.b32.xlu1 %v2477_v0, %s2479_s22 }
 0x195   : > { %1418 = vrot.lane.b32.xlu0 %v915_v62, %s2480_s23 }
 0x196   : > { %1420 = vrot.lane.b32.xlu1 %v916_v3, %s2480_s23 }
 0x199   : > { %1422 = vrot.lane.b32.xlu0 %v917_v5, %s2480_s23 }
 0x19a   : > { %1424 = vrot.lane.b32.xlu1 %v918_v6, %s2480_s23 }
 0x19d   : > { %1416 = vrot.lane.b32.xlu0 %v2477_v0, %s2480_s23 }
 0x19e   : > { %1587 = vperm.xlu1 %2467, %v2399_v7  }
 0x1f3   : > { %v940_v8 = vpop.permute.xlu0 %939 }
 0x1f4   : > { %v942_v9 = vpop.permute.xlu1 %941 }
 0x1f5   : > { %v948_v10 = vsel %vm231_vm0, %v940_v8, %v942_v9 }
 0x1f6   : > { %958 = vmatprep.subr.mxu0 %v948_v10 }
 0x1f7   : > { %v944_v11 = vpop.permute.xlu0 %943 }
 0x1f8   : > { %v946_v12 = vpop.permute.xlu1 %945  ;;  %v949_v15 = vsel %vm231_vm0, %v942_v9, %v944_v11  ;;  %v2402_v9 = vld [vmem:[%s2743_s1 + $0x48] sm:$0xff] }
 0x1f9   : > { %v950_v13 = vsel %vm231_vm0, %v944_v11, %v946_v12 }
 0x1fa   : > { %1029 = vmatprep.subr.mxu1 %v950_v13 }
 0x1fb   : > { %v938_v16 = vpop.permute.xlu0 %937  ;;  %1030 = vmatpush1.msra.mxu1 %v949_v15 }
 0x1fc   : > { %v947_v17 = vsel %vm231_vm0, %v938_v16, %v940_v8  ;;  %2390 = vmatmul.mubr.msk.f32.vlgmr.msra.gmra.mrb[2].mxu1 %vm240_vm1, %v2388_v14  ;;  %1174 = vmatprep.subr.mxu1 %v918_v6  ;;  %v1250_v18 = vpop.permute.xlu1 %1249 }
 0x1fd   : > { %959 = vmatpush1.msra.mxu0 %v947_v17  ;;  %1175 = vmatpush1.msra.mxu1 %v917_v5  ;;  %v2401_v17 = vld [vmem:[%s2743_s1 + $0x40] sm:$0xff] }
 0x1fe   : > { %2389 = vmatmul.mubr.msk.f32.vlgmr.msra.gmra.mrb[2].mxu0 %vm240_vm1, %v2388_v14  ;;  %1103 = vmatprep.subr.mxu0 %v916_v3 }
 0x1ff   : > { %v1252_v19 = vpop.permute.xlu0 %1251  ;;  %1104 = vmatpush1.msra.mxu0 %v915_v62  ;;  %1238 = vmatprep.mubr.f32.mxu1 %v2477_v0 }
 0x200   : > { %v1254_v20 = vpop.permute.xlu1 %1253  ;;  %v1258_v21 = vsel %vm543_vm2, %v1250_v18, %v1252_v19  ;;  %1167 = vmatprep.mubr.f32.mxu0 %v2477_v0 }
 0x201   : > { %1268 = vmatprep.subr.mxu0 %v1258_v21  ;;  %v1259_v26 = vsel %vm543_vm2, %v1252_v19, %v1254_v20 }
 0x203   : > { %v1256_v23 = vpop.permute.xlu0 %1255 }
 0x204   : > { %2392 = vmatmul.mubr.msk.f32.vlgmr.msra.gmra.mrb[2].mxu1 %vm240_vm1, %v2387_v22  ;;  %v1248_v24 = vpop.permute.xlu1 %1247  ;;  %v1260_v25 = vsel %vm543_vm2, %v1254_v20, %v1256_v23 }
 0x205   : > { %v1257_v27 = vsel %vm543_vm2, %v1248_v24, %v1250_v18  ;;  %1339 = vmatprep.subr.mxu1 %v1260_v25  ;;  %1403 = vmatprep.mubr.f32.mxu1 %v2477_v0 }
 0x206   : > { %2391 = vmatmul.mubr.msk.f32.vlgmr.msra.gmra.mrb[2].mxu0 %vm240_vm1, %v2387_v22  ;;  %1340 = vmatpush1.msra.mxu1 %v1259_v26  ;;  %v2407_v26 = vld [vmem:[%s2743_s1 + $0x50] sm:$0xff] }
 0x207   : > { %1269 = vmatpush1.msra.mxu0 %v1257_v27  ;;  %v1419_v28 = vpop.permute.xlu0 %1418  ;;  %1332 = vmatprep.mubr.f32.mxu0 %v2477_v0 }
 0x208   : > { %v1421_v29 = vpop.permute.xlu1 %1420 }
 0x209   : > { %v1427_v30 = vsel %vm713_vm3, %v1419_v28, %v1421_v29 }
 0x20a   : > { %1437 = vmatprep.subr.mxu0 %v1427_v30 }
 0x20b   : > { %v1423_v32 = vpop.permute.xlu0 %1422 }
 0x20c   : > { %2395 = vmatmul.mubr.msk.f32.vlgmr.msra.gmra.mrb[2].mxu1 %vm240_vm1, %v2393_v31  ;;  %v1425_v33 = vpop.permute.xlu1 %1424  ;;  %v1428_v35 = vsel %vm713_vm3, %v1421_v29, %v1423_v32 }
 0x20d   : > { %v1429_v34 = vsel %vm713_vm3, %v1423_v32, %v1425_v33  ;;  %1572 = vmatprep.mubr.f32.mxu1 %v2477_v0  ;;  %v2410_v33 = vld [vmem:[%s2743_s1 + $0x58] sm:$0xff] }
 0x20e   : > { %2394 = vmatmul.mubr.msk.f32.vlgmr.msra.gmra.mrb[2].mxu0 %vm240_vm1, %v2393_v31  ;;  %1508 = vmatprep.subr.mxu1 %v1429_v34 }
 0x20f   : > { %v1417_v36 = vpop.permute.xlu0 %1416  ;;  %1509 = vmatpush1.msra.mxu1 %v1428_v35  ;;  %1501 = vmatprep.mubr.f32.mxu0 %v2477_v0 }
 0x210   : > { %v1426_v37 = vsel %vm713_vm3, %v1417_v36, %v1419_v28 }
 0x211   : > { %1438 = vmatpush1.msra.mxu0 %v1426_v37 }
 0x214   : > { %2398 = vmatmul.mubr.msk.f32.vlgmr.msra.gmra.mrb[2].mxu1 %vm240_vm1, %v2396_v38 }
 0x215   : > { %1807 = vmatprep.mubr.f32.mxu1 %v2477_v0 }
 0x216   : > { %2397 = vmatmul.mubr.msk.f32.vlgmr.msra.gmra.mrb[2].mxu0 %vm240_vm1, %v2396_v38 }
 0x217   : > { %1736 = vmatprep.mubr.f32.mxu0 %v2477_v0 }
 0x21d   : > { %v1588_v39 = vpop.permute.xlu1 %1587 }
 0x2e7   : > { %v1574_v41 = vpop.f32.mrb[2].mxu1 }
 0x2e8   : > { %v1592_v42 = vadd.f32 %v1588_v39, %v1574_v41  ;;  %v1576_v44 = vpop.f32.mrb[3].mxu1 }
 0x2e9   : > { %v1593_v46 = vadd.f32 %v1588_v39, %v1576_v44  ;;  %v1503_v47 = vpop.f32.mrb[2].mxu0 }
 0x2ea   : > { %v1590_v49 = vadd.f32 %v1588_v39, %v1503_v47  ;;  %v1505_v50 = vpop.f32.mrb[3].mxu0  ;;  %v1600_v55 = vmul.f32 0.01, %v1592_v42  ;;  %vm1596_vm9 = vcmp.ge.f32.partialorder %v1592_v42, 0.0 }
 0x2eb   : > { %v1591_v54 = vadd.f32 %v1588_v39, %v1505_v50  ;;  %v1601_v58 = vmul.f32 0.01, %v1593_v46  ;;  %vm1597_vm11 = vcmp.ge.f32.partialorder %v1593_v46, 0.0 }
 0x2ec   : > { %vm1594_vm8 = vcmp.ge.f32.partialorder %v1590_v49, 0.0  ;;  %v1598_v56 = vmul.f32 0.01, %v1590_v49  ;;  %v1604_v1 = vsel %vm1596_vm9, %v1592_v42, %v1600_v55 }
 0x2ed   : > { %vm1595_vm10 = vcmp.ge.f32.partialorder %v1591_v54, 0.0  ;;  %v1599_v59 = vmul.f32 0.01, %v1591_v54  ;;  %v1605_v3 = vsel %vm1597_vm11, %v1593_v46, %v1601_v58  ;;  %v1631_v45 = vmul.f32 %v1620_v61, %v1604_v1 }
 0x2ee   : > { %v1602_v60 = vsel %vm1594_vm8, %v1590_v49, %v1598_v56  ;;  %v1632_v4 = vmul.f32 %v1624_v43, %v1605_v3 }
 0x2ef   : > { %v1629_v62 = vmul.f32 %v1612_v53, %v1602_v60  ;;  %v1603_v63 = vsel %vm1595_vm10, %v1591_v54, %v1599_v59 }
 0x2f0   : > { %v1630_v2 = vmul.f32 %v1616_v57, %v1603_v63 }
 0x2f1   : > { %1653 = vrot.lane.b32.xlu0 %v1629_v62, %s2478_s21 }
 0x2f2   : > { %1655 = vrot.lane.b32.xlu1 %v1630_v2, %s2478_s21 }
 0x2f5   : > { %1657 = vrot.lane.b32.xlu0 %v1631_v45, %s2478_s21 }
 0x2f6   : > { %1659 = vrot.lane.b32.xlu1 %v1632_v4, %s2478_s21 }
 0x2f9   : > { %1651 = vrot.lane.b32.xlu0 %v2477_v0, %s2478_s21 }
 0x2fa   : > { %1963 = vrot.lane.b32.xlu1 %v1629_v62, %s2479_s22 }
 0x2fd   : > { %1965 = vrot.lane.b32.xlu0 %v1630_v2, %s2479_s22 }
 0x2fe   : > { %1967 = vrot.lane.b32.xlu1 %v1631_v45, %s2479_s22 }
 0x301   : > { %1969 = vrot.lane.b32.xlu0 %v1632_v4, %s2479_s22 }
 0x302   : > { %1961 = vrot.lane.b32.xlu1 %v2477_v0, %s2479_s22 }
 0x305   : > { %2132 = vrot.lane.b32.xlu0 %v1629_v62, %s2480_s23 }
 0x306   : > { %2134 = vrot.lane.b32.xlu1 %v1630_v2, %s2480_s23 }
 0x309   : > { %2136 = vrot.lane.b32.xlu0 %v1631_v45, %s2480_s23 }
 0x30a   : > { %2138 = vrot.lane.b32.xlu1 %v1632_v4, %s2480_s23 }
 0x30d   : > { %2130 = vrot.lane.b32.xlu0 %v2477_v0, %s2480_s23 }
 0x30e   : > { %2301 = vperm.xlu1 %2467, %v2413_v40  }
 0x363   : > { %v1654_v51 = vpop.permute.xlu0 %1653 }
 0x364   : > { %v1656_v52 = vpop.permute.xlu1 %1655 }
 0x365   : > { %v1662_v5 = vsel %vm231_vm0, %v1654_v51, %v1656_v52 }
 0x366   : > { %1672 = vmatprep.subr.mxu0 %v1662_v5 }
 0x367   : > { %v1658_v6 = vpop.permute.xlu0 %1657 }
 0x368   : > { %v1660_v7 = vpop.permute.xlu1 %1659  ;;  %v1663_v10 = vsel %vm231_vm0, %v1656_v52, %v1658_v6 }
 0x369   : > { %v1664_v8 = vsel %vm231_vm0, %v1658_v6, %v1660_v7 }
 0x36a   : > { %1743 = vmatprep.subr.mxu1 %v1664_v8 }
 0x36b   : > { %1744 = vmatpush1.msra.mxu1 %v1663_v10  ;;  %v1652_v11 = vpop.permute.xlu0 %1651 }
 0x36c   : > { %v1661_v12 = vsel %vm231_vm0, %v1652_v11, %v1654_v51  ;;  %v1964_v13 = vpop.permute.xlu1 %1963  ;;  %2404 = vmatmul.mubr.msk.f32.vlgmr.msra.gmra.mrb[4].mxu1 %vm240_vm1, %v2402_v9  ;;  %1888 = vmatprep.subr.mxu1 %v1632_v4 }
 0x36d   : > { %1673 = vmatpush1.msra.mxu0 %v1661_v12  ;;  %1889 = vmatpush1.msra.mxu1 %v1631_v45 }
 0x36e   : > { %2403 = vmatmul.mubr.msk.f32.vlgmr.msra.gmra.mrb[4].mxu0 %vm240_vm1, %v2402_v9  ;;  %1817 = vmatprep.subr.mxu0 %v1630_v2 }
 0x36f   : > { %1818 = vmatpush1.msra.mxu0 %v1629_v62  ;;  %v1966_v14 = vpop.permute.xlu0 %1965  ;;  %1952 = vmatprep.mubr.f32.mxu1 %v2477_v0 }
 0x370   : > { %v1968_v15 = vpop.permute.xlu1 %1967  ;;  %v1972_v16 = vsel %vm543_vm2, %v1964_v13, %v1966_v14  ;;  %1881 = vmatprep.mubr.f32.mxu0 %v2477_v0 }
 0x371   : > { %1982 = vmatprep.subr.mxu0 %v1972_v16  ;;  %v1973_v21 = vsel %vm543_vm2, %v1966_v14, %v1968_v15 }
 0x373   : > { %v1970_v18 = vpop.permute.xlu0 %1969 }
 0x374   : > { %v1962_v19 = vpop.permute.xlu1 %1961  ;;  %2406 = vmatmul.mubr.msk.f32.vlgmr.msra.gmra.mrb[4].mxu1 %vm240_vm1, %v2401_v17  ;;  %v1974_v20 = vsel %vm543_vm2, %v1968_v15, %v1970_v18 }
 0x375   : > { %v1971_v22 = vsel %vm543_vm2, %v1962_v19, %v1964_v13  ;;  %2053 = vmatprep.subr.mxu1 %v1974_v20  ;;  %2117 = vmatprep.mubr.f32.mxu1 %v2477_v0 }
 0x376   : > { %2405 = vmatmul.mubr.msk.f32.vlgmr.msra.gmra.mrb[4].mxu0 %vm240_vm1, %v2401_v17  ;;  %2054 = vmatpush1.msra.mxu1 %v1973_v21 }
 0x377   : > { %1983 = vmatpush1.msra.mxu0 %v1971_v22  ;;  %v2133_v23 = vpop.permute.xlu0 %2132  ;;  %2046 = vmatprep.mubr.f32.mxu0 %v2477_v0 }
 0x378   : > { %v2135_v24 = vpop.permute.xlu1 %2134 }
 0x379   : > { %v2141_v25 = vsel %vm713_vm3, %v2133_v23, %v2135_v24 }
 0x37a   : > { %2151 = vmatprep.subr.mxu0 %v2141_v25 }
 0x37b   : > { %v2137_v27 = vpop.permute.xlu0 %2136 }
 0x37c   : > { %v2139_v28 = vpop.permute.xlu1 %2138  ;;  %2409 = vmatmul.mubr.msk.f32.vlgmr.msra.gmra.mrb[4].mxu1 %vm240_vm1, %v2407_v26  ;;  %v2142_v30 = vsel %vm713_vm3, %v2135_v24, %v2137_v27 }
 0x37d   : > { %v2143_v29 = vsel %vm713_vm3, %v2137_v27, %v2139_v28  ;;  %2286 = vmatprep.mubr.f32.mxu1 %v2477_v0 }
 0x37e   : > { %2408 = vmatmul.mubr.msk.f32.vlgmr.msra.gmra.mrb[4].mxu0 %vm240_vm1, %v2407_v26  ;;  %2222 = vmatprep.subr.mxu1 %v2143_v29 }
 0x37f   : > { %2223 = vmatpush1.msra.mxu1 %v2142_v30  ;;  %v2131_v31 = vpop.permute.xlu0 %2130  ;;  %2215 = vmatprep.mubr.f32.mxu0 %v2477_v0 }
 0x380   : > { %v2140_v32 = vsel %vm713_vm3, %v2131_v31, %v2133_v23 }
 0x381   : > { %2152 = vmatpush1.msra.mxu0 %v2140_v32 }
 0x384   : > { %2412 = vmatmul.mubr.msk.f32.vlgmr.msra.gmra.mrb[4].mxu1 %vm240_vm1, %v2410_v33 }
 0x386   : > { %2411 = vmatmul.mubr.msk.f32.vlgmr.msra.gmra.mrb[4].mxu0 %vm240_vm1, %v2410_v33 }
 0x38d   : > { %v2302_v34 = vpop.permute.xlu1 %2301 }
 0x457   : > { %v2288_v35 = vpop.f32.mrb[4].mxu1 }
 0x458   : > { %v2306_v36 = vadd.f32 %v2302_v34, %v2288_v35  ;;  %v2290_v0 = vpop.f32.mrb[5].mxu1 }
 0x459   : > { %v2307_v37 = vadd.f32 %v2302_v34, %v2290_v0  ;;  %v2217_v38 = vpop.f32.mrb[4].mxu0 }
 0x45a   : > { %2310 = vst [vmem:[%s197_s11 + $0x10] sm:$0xff] %v2306_v36  ;;  %v2304_v39 = vadd.f32 %v2302_v34, %v2217_v38  ;;  %v2219_v41 = vpop.f32.mrb[5].mxu0 }
 0x45b   : > { %2311 = vst [vmem:[%s197_s11 + $0x18] sm:$0xff] %v2307_v37  ;;  %v2305_v42 = vadd.f32 %v2302_v34, %v2219_v41 }
 0x45c   : > { %2308 = vst [vmem:[%s197_s11] sm:$0xff] %v2304_v39 }
 0x45d   : > { %2309 = vst [vmem:[%s197_s11 + $0x8] sm:$0xff] %v2305_v42 }
 0x45e PF: > { %s14_s15 = sadd.s32 1, %s2475_s15  }
 0x45f   : > { %p11_p4 = scmp.ge.s32.totalorder %s14_s15, 4  }
 0x461   :  { %13 = sbr.rel (!%p11_p4) target bundleno = 1 (0x1), region = 80 }

</bundles_post_ra>
